<compile_context>
chip_gen: v5e
topology: v5e:2x2
jax: 0.10.0
libtpu: 0.0.40
codegen_flags: <defaults>
</compile_context>

<pallas_src>
import jax
import jax.numpy as jnp
from jax.experimental import pallas as pl
from jax.experimental.pallas import tpu as pltpu

_LANES = 128


def _sq_err_kernel(res_ref, tgt_ref, out_ref):
    diff = res_ref[...].astype(jnp.float32) - tgt_ref[...].astype(jnp.float32)
    out_ref[...] = (diff * diff).astype(out_ref.dtype)


def nerf_loss(results: jax.Array, target: jax.Array, *,
              block_rows: int = 4096,
              alias_results: bool = False,
              min_pallas_elems: int = 1 << 20):
    """Returns {'rgb': (results - target) ** 2}.

    Large, 128-aligned inputs go through a lane-dense Pallas kernel; small or
    misaligned inputs use a plain fused XLA elementwise op (same roofline).
    Set alias_results=True (and donate `results` under jit) to reuse the
    `results` buffer for the output (12 -> 8 B/elem HBM traffic).
    """
    assert results.shape == target.shape, "results/target shape mismatch"
    orig_shape = results.shape
    out_dtype = jnp.result_type(results.dtype, target.dtype)
    n_elem = int(results.size)

    # Fallback: tiny batches or sizes not divisible by 128.  A fused XLA
    # elementwise op is already HBM-bound at 12 B/elem and has no launch cost.
    if n_elem == 0 or n_elem < min_pallas_elems or n_elem % _LANES != 0:
        diff = results.astype(jnp.float32) - target.astype(jnp.float32)
        return {"rgb": (diff * diff).astype(out_dtype)}

    itemsizes = [jnp.dtype(results.dtype).itemsize,
                 jnp.dtype(target.dtype).itemsize,
                 jnp.dtype(out_dtype).itemsize]
    # Sublane tile requirement is set by the narrowest dtype involved
    # (8 rows for 4-byte, 16 for 2-byte, 32 for 1-byte).
    sublane = max(8, 32 // min(itemsizes))

    rows = n_elem // _LANES

    # Effective block rows: large enough to amortize the ~0.35 us per-grid-step
    # overhead, but capped so medium inputs still produce >= ~4 grid steps
    # (the "parallel" axis only shards across v7x's 2 TCs with multiple steps).
    target_blocks = 4
    br = max(sublane, (block_rows // sublane) * sublane)
    cap = pl.cdiv(pl.cdiv(rows, target_blocks), sublane) * sublane
    block_rows_eff = max(sublane, min(br, cap))

    grid = (pl.cdiv(rows, block_rows_eff),)

    # Zero-copy lane-dense views (reshape of a contiguous array is a bitcast).
    res2d = results.reshape(rows, _LANES)
    tgt2d = target.reshape(rows, _LANES)

    spec = pl.BlockSpec((block_rows_eff, _LANES), lambda i: (i, 0))

    # Explicit VMEM budget: 3 arrays x 2 pipeline buffers x block bytes,
    # plus headroom, so the same tiling works on v5e/v6e/v7x defaults.
    vmem_bytes = 2 * block_rows_eff * _LANES * sum(itemsizes)
    vmem_limit = int(min(vmem_bytes + (2 << 20), 64 << 20))

    io_aliases = {}
    if alias_results and results.dtype == out_dtype:
        io_aliases = {0: 0}

    out2d = pl.pallas_call(
        _sq_err_kernel,
        out_shape=jax.ShapeDtypeStruct((rows, _LANES), out_dtype),
        grid=grid,
        in_specs=[spec, spec],
        out_specs=spec,
        input_output_aliases=io_aliases,
        compiler_params=pltpu.CompilerParams(
            dimension_semantics=("parallel",),
            vmem_limit_bytes=vmem_limit,
        ),
    )(res2d, tgt2d)

    # TODO(synk): optionally fuse a mean/sum reduction into the kernel
    # (per-block partial sums) for callers that only need the scalar loss.
    return {"rgb": out2d.reshape(orig_shape)}


if __name__ == "__main__":
    key = jax.random.PRNGKey(0)
    k1, k2, k3, k4, k5, k6 = jax.random.split(key, 6)

    # 1) NeRF-style (rays, 3) shape whose size is a multiple of 128:
    #    forced through the Pallas path (multi-block, exact tiling).
    n_rays, c = 1024, 3
    results = jax.random.uniform(k1, (n_rays, c), dtype=jnp.float32)
    target = jax.random.uniform(k2, (n_rays, c), dtype=jnp.float32)
    out = nerf_loss(results, target, min_pallas_elems=0)
    jax.block_until_ready(out["rgb"])
    ref = (results - target) ** 2
    assert out["rgb"].shape == ref.shape
    assert out["rgb"].dtype == ref.dtype
    assert jnp.allclose(out["rgb"], ref, atol=1e-6), "mismatch (pallas path)"

    # 2) Tiny batch: default threshold routes to the plain-jnp fast path.
    results2 = jax.random.uniform(k3, (64, 3), dtype=jnp.float32)
    target2 = jax.random.uniform(k4, (64, 3), dtype=jnp.float32)
    out2 = nerf_loss(results2, target2)
    jax.block_until_ready(out2["rgb"])
    ref2 = (results2 - target2) ** 2
    assert jnp.allclose(out2["rgb"], ref2, atol=1e-6), "mismatch (fallback)"

    # 3) Pallas path with a partial boundary block (rows not divisible by the
    #    effective block) and results aliased to the output.
    n_rays3, c3 = 2560, 3            # 7680 elems -> 60 lane-dense rows
    results3 = jax.random.uniform(k5, (n_rays3, c3), dtype=jnp.float32)
    target3 = jax.random.uniform(k6, (n_rays3, c3), dtype=jnp.float32)
    ref3 = (results3 - target3) ** 2
    out3 = nerf_loss(results3, target3, min_pallas_elems=0, alias_results=True)
    jax.block_until_ready(out3["rgb"])
    assert out3["rgb"].shape == ref3.shape
    assert jnp.allclose(out3["rgb"], ref3, atol=1e-6), "mismatch (aliased/partial)"

    print("KERNEL_OK")
</pallas_src>

<mosaic_0001>
module attributes {stable_mosaic.version = 11 : i64} {
  func.func @_sq_err_kernel(%arg0: i32, %arg1: memref<8x128xf32, #tpu.memory_space<vmem>>, %arg2: memref<8x128xf32, #tpu.memory_space<vmem>>, %arg3: memref<8x128xf32, #tpu.memory_space<vmem>>) attributes {dimension_semantics = [#tpu.dimension_semantics<parallel>], iteration_bounds = array<i64: 3>, scalar_prefetch = 0 : i64, scratch_operands = 0 : i64, tpu.core_type = #tpu.core_type<tc>, window_params = [{transform_indices = @transform_0, window_bounds = array<i64: 8, 128>}, {transform_indices = @transform_1, window_bounds = array<i64: 8, 128>}, {transform_indices = @transform_2, window_bounds = array<i64: 8, 128>}]} {
    %c0 = arith.constant 0 : index
    %c0_0 = arith.constant 0 : index
    %0 = vector.load %arg1[%c0, %c0_0] : memref<8x128xf32, #tpu.memory_space<vmem>>, vector<8x128xf32>
    %c0_1 = arith.constant 0 : index
    %c0_2 = arith.constant 0 : index
    %1 = vector.load %arg2[%c0_1, %c0_2] : memref<8x128xf32, #tpu.memory_space<vmem>>, vector<8x128xf32>
    %2 = arith.subf %0, %1 : vector<8x128xf32>
    %3 = arith.mulf %2, %2 : vector<8x128xf32>
    %c0_3 = arith.constant 0 : index
    %c0_4 = arith.constant 0 : index
    %4 = vector.load %arg3[%c0_3, %c0_4] : memref<8x128xf32, #tpu.memory_space<vmem>>, vector<8x128xf32>
    tpu.vector_store %arg3[%c0_3, %c0_4], %3 {strides = array<i32>} : memref<8x128xf32, #tpu.memory_space<vmem>>, vector<8x128xf32>,
    return
  }
  func.func @transform_0(%arg0: i32) -> (i32, i32) {
    %c0_i32 = arith.constant 0 : i32
    %c0_i32_0 = arith.constant 0 : i32
    return %arg0, %c0_i32 : i32, i32
  }
  func.func @transform_1(%arg0: i32) -> (i32, i32) {
    %c0_i32 = arith.constant 0 : i32
    %c0_i32_0 = arith.constant 0 : i32
    return %arg0, %c0_i32 : i32, i32
  }
  func.func @transform_2(%arg0: i32) -> (i32, i32) {
    %c0_i32 = arith.constant 0 : i32
    %c0_i32_0 = arith.constant 0 : i32
    return %arg0, %c0_i32 : i32, i32
  }
}

</mosaic_0001>

<bundles_post_ra>
// kernel: tpu_custom_call.1
= control target key start
LH: loop header
LB: loop body
LE: loop exit
PB: predicated region body
PF: predicated region fallthrough
CT: control target
= control target key end

     0   :  { %7 = vsyncpa [#allocation3], 0  ;;  %s685_s0 = inlined_call_operand.hbm [shape: f32[24,128], index: 0, kind: input, shape index: {}]   ;;  %s686_s1 = inlined_call_operand.hbm [shape: f32[24,128], index: 1, kind: input, shape index: {}]   ;;  %s687_s2 = inlined_call_operand.hbm [shape: f32[24,128], index: 2, kind: output, shape index: {}]  }
   0x1   :  { %9 = vsyncpa [#allocation3 + $0x1], 0 }
   0x2   :  { %10 = vsyncpa [#allocation6], 0 }
   0x3   :  { %12 = vsyncpa [#allocation6 + $0x1], 0 }
   0x4   :  { %13 = vsyncpa [#allocation4], 0 }
   0x5   :  { %15 = vsyncpa [#allocation4 + $0x1], 0  ;;  %s527_s9 = smov 0   ;;  %s529_s10 = smov 0  }
   0x6   :  { %s531_s11 = smov 0   ;;  %s533_s12 = smov 0  }
   0x7 LB: > { %s548_s13 = sadd.s32 4294967295, %s510_s12   ;;  %s314_s14 = sadd.s32 4294967294, %s510_s12   ;;  %s510_s12 = sphi %s533_s12, %s697_s12   ;;  %s506_s11 = sphi %s531_s11, %s696_s11   ;;  %s502_s10 = sphi %s529_s10, %s695_s10   ;;  %s498_s9 = sphi %s527_s9, %s694_s9  }
   0x8   : > { %s552_s15 = sadd.s32 1, %s510_s12   ;;  %s28_s16 = sadd.s32 1, %s506_s11 }
   0x9   : > { %s25_s17 = ssub.s32 %s510_s12, %s552_s15  ;;  %p35_p0 = scmp.ne.s32.totalorder %s506_s11, %s502_s10 }
   0xa   : > { %p26_p1 = scmp.eq.s32.totalorder %s25_s17, 0  ;;  %p36_p2 = scmp.eq.s32.totalorder %s510_s12, 0 }
   0xb   : > { %p41_p3 = scmp.ne.s32.totalorder %s502_s10, %s498_s9  ;;  %p42_p4 = scmp.eq.s32.totalorder %s548_s13, 0 }
   0xc   : > { %s564_s18 = scalar_select %p26_p1, %s506_s11, %s28_s16  }
   0xd   : > { %p566_p5 = por %p36_p2, %p35_p0  ;;  %p570_p6 = por %p42_p4, %p41_p3 }
   0xe   : > { %p91_p7 = scmp.eq.s32.totalorder %s548_s13, 2  ;;  %p97_p8 = scmp.eq.s32.totalorder %s314_s14, 2 }
   0xf   : > { %p346_p9 = scmp.lt.s32.totalorder %s510_s12, 3  ;;  %s585_s23 = sand.u32 1, %s506_s11  }
  0x10   : > { %p576_p10 = por %p91_p7, %p35_p0  ;;  %p580_p11 = por %p97_p8, %p41_p3 }
  0x11   : > { %s318_s24 = sshll.u32 %s510_s12, 3  ;;  %s317_s25 = sshll.u32 %s585_s23, 3 }
  0x12   : > { %s125_s28 = scalar_lea.hbm %s685_s0, %s318_s24  ;;  %s121_s30 = scalar_lea.vmem [#allocation2], %s317_s25 }
  0x13   : > { %s127_s29 = sshll.u32 %s125_s28, 4  ;;  %s129_s3 = sshll.u32 %s121_s30, 4  ;;  %s128_s29 = int_to_ptr.hbm [resolvable:$true] %s127_s29  ;;  %s130_s3 = int_to_ptr.vmem [resolvable:$true] %s129_s3 }
  0x14   : > { %p594_p12 = pnand %p346_p9, %p566_p5  ;;  %p321_p13 = scmp.ge.s32.totalorder %s510_s12, 1 }
  0x15   : > { %p153_p0 = scmp.lt.s32.totalorder %s510_s12, 4  ;;  %s118_s5 = scalar_lea.sflag [#allocation3], %s585_s23 }
  0x16   : > { %s380_s6 = sshra.s32 %s128_s29, 4  ;;  %p384_p2 = pneg %p594_p12  ;;  %s381_s6 = int_to_ptr.hbm [resolvable:$true] %s380_s6 }
  0x17   : > { %s382_s7 = scalar_lea.hbm %s381_s6, 8  ;;  %s387_s16 = scalar_lea.hbm %s685_s0, 24 }
  0x18   : > { %p383_p1 = scmp.ne.s32.totalorder %s381_s6, %s382_s7  ;;  %p388_p5 = scmp.lt.s32.totalorder %s381_s6, %s685_s0 }
  0x19   : > { %p389_p7 = scmp.lt.s32.totalorder %s387_s16, %s382_s7 }
  0x1a   : > { %p385_p3 = pnand %p384_p2, %p383_p1 }
  0x1b   : > { %p390_p8 = por %p389_p7, %p388_p5 }
  0x1c   : > { %p386_p4 = pneg %p385_p3 }
  0x1e   : > { %p391_p9 = pnand %p390_p8, %p386_p4 }
  0x20   : > { %394 = shalt.err (!%p391_p9)
}
  0x21   : > { %338 = dma.hbm_to_vmem [thread:$0]  (!%p594_p12), %s128_s29, 128, %s130_s3, %s118_s5  }
  0x22   : > { %p618_p1 = pnand %p321_p13, %p153_p0  ;;  %s144_s30 = scalar_lea.hbm %s686_s1, %s318_s24 }
  0x23   : > { %s146_s6 = sshll.u32 %s144_s30, 4  ;;  %s140_s7 = scalar_lea.vmem [#allocation5], %s317_s25  ;;  %s147_s6 = int_to_ptr.hbm [resolvable:$true] %s146_s6 }
  0x24   : > { %s148_s8 = sshll.u32 %s140_s7, 4  ;;  %s137_s14 = scalar_lea.sflag [#allocation6], %s585_s23  ;;  %s149_s8 = int_to_ptr.vmem [resolvable:$true] %s148_s8 }
  0x25   : > { %s410_s16 = sshra.s32 %s147_s6, 4  ;;  %s417_s5 = scalar_lea.hbm %s686_s1, 24  ;;  %s411_s16 = int_to_ptr.hbm [resolvable:$true] %s410_s16 }
  0x26   : > { %s412_s17 = scalar_lea.hbm %s411_s16, 8  ;;  %p418_p4 = scmp.lt.s32.totalorder %s411_s16, %s686_s1 }
  0x27   : > { %p413_p3 = scmp.ne.s32.totalorder %s411_s16, %s412_s17  ;;  %p419_p5 = scmp.lt.s32.totalorder %s417_s5, %s412_s17 }
  0x29   : > { %p415_p13 = pnand %p413_p3, %p384_p2  ;;  %p420_p7 = por %p419_p5, %p418_p4 }
  0x2b   : > { %p416_p0 = pneg %p415_p13 }
  0x2d   : > { %p421_p8 = pnand %p420_p7, %p416_p0 }
  0x2f   : > { %424 = shalt.err (!%p421_p8)
}
  0x30   : > { %341 = dma.hbm_to_vmem [thread:$0]  (!%p594_p12), %s147_s6, 128, %s149_s8, %s137_s14  }
  0x31   : > { %157 = sbr.rel (%p618_p1) target bundleno = 72 (0x48), region = 28  ;;  %s640_s23 = sand.u32 (!%p618_p1), 1, %s502_s10  }
  0x32   : > { %s322_s25 = sshll.u32 (!%p618_p1), %s640_s23, 3  ;;  %s160_s27 = scalar_lea.sflag (!%p618_p1), [#allocation3], %s640_s23 }
  0x33   : > { %s163_s28 = scalar_lea.vmem (!%p618_p1), [#allocation2], %s322_s25 }
  0x36   : > { %485 = dma.done.wait (%p570_p6), %s160_s27, 128  }
  0x37   : > { %487 = vsyncadd (%p570_p6), %s160_s27, 4294967168  ;;  %s170_s4 = scalar_lea.sflag [#allocation6], %s640_s23  ;;  %s173_s30 = scalar_lea.vmem [#allocation5], %s322_s25 }
  0x38   : > { %489 = dma.done.wait (%p570_p6), %s170_s4, 128  }
  0x39   : > { %491 = vsyncadd (%p570_p6), %s170_s4, 4294967168  ;;  %s326_s26 = sshll.u32 %s548_s13, 3  ;;  %v200_v0 = vld [vmem:[%s163_s28] sm:$0xff]  ;;  %v201_v1 = vld [vmem:[%s173_s30] sm:$0xff]  ;;  %s199_s14 = scalar_lea.vmem [#allocation7], %s322_s25 }
  0x3a   : > { %s216_s8 = scalar_lea.hbm %s687_s2, %s326_s26  ;;  %s218_s16 = sshll.u32 %s199_s14, 4  ;;  %v202_v2 = vsub.f32 %v200_v0, %v201_v1  ;;  %s219_s16 = int_to_ptr.vmem [resolvable:$true] %s218_s16 }
  0x3b   : > { %s220_s17 = sshll.u32 %s216_s8, 4  ;;  %s206_s20 = scalar_lea.sflag [#allocation4], %s640_s23  ;;  %s221_s17 = int_to_ptr.hbm [resolvable:$true] %s220_s17 }
  0x3c   : > { %v203_v3 = vmul.f32 %v202_v2, %v202_v2  ;;  %s454_s29 = sshra.s32 %s221_s17, 4  ;;  %s460_s19 = scalar_lea.hbm %s687_s2, 24  ;;  %s455_s29 = int_to_ptr.hbm [resolvable:$true] %s454_s29 }
  0x3d   : > { %s456_s3 = scalar_lea.hbm %s455_s29, 8  ;;  %p461_p9 = scmp.lt.s32.totalorder %s455_s29, %s687_s2 }
  0x3e   : > { %204 = vst [vmem:[%s199_s14] sm:$0xff] %v203_v3  ;;  %p457_p6 = scmp.ne.s32.totalorder %s455_s29, %s456_s3  ;;  %p462_p1 = scmp.lt.s32.totalorder %s460_s19, %s456_s3 }
  0x40   : > { %p458_p12 = pnand %p457_p6, %p576_p10  ;;  %p463_p3 = por %p462_p1, %p461_p9 }
  0x42   : > { %p459_p2 = pneg %p458_p12 }
  0x44   : > { %p464_p13 = pnand %p463_p3, %p459_p2 }
  0x46   : > { %467 = shalt.err (!%p464_p13)
}
  0x47   : > { %333 = dma.vmem_to_hbm [thread:$0]  (%p576_p10), %s219_s16, 128, %s221_s17, %s206_s20  }
  0x48 PF: > { %p347_p0 = scmp.ge.s32.totalorder %s510_s12, 2  ;;  %s232_s23 = sand.u32 1, %s498_s9  }
  0x49   : > { %s233_s27 = scalar_lea.sflag [#allocation4], %s232_s23 }
  0x4a   : > { %p343_p4 = pnand %p347_p0, %p580_p11 }
  0x4c   : > { %p344_p5 = pneg %p343_p4 }
  0x4e   : > { %493 = dma.done.wait (%p344_p5), %s233_s27, 128  }
  0x4f   : > { %495 = vsyncadd (%p344_p5), %s233_s27, 4294967168  ;;  %p18_p7 = scmp.ge.s32.totalorder %s552_s15, 5   ;;  %s694_s9 = smov %s502_s10 }
  0x50   : > { %s695_s10 = smov %s506_s11  ;;  %s696_s11 = smov %s564_s18 }
  0x51   : > { %s697_s12 = smov %s552_s15  ;;  %20 = sbr.rel (!%p18_p7) target bundleno = 7 (0x7), region = 86 }
  0x56   :  { %239 = vsyncpa [#allocation3], 1 }
  0x57   :  { %241 = vsyncpa [#allocation3 + $0x1], 1 }
  0x58   :  { %242 = vsyncpa [#allocation6], 1 }
  0x59   :  { %244 = vsyncpa [#allocation6 + $0x1], 1 }
  0x5a   :  { %245 = vsyncpa [#allocation4], 1 }
  0x5b   :  { %247 = vsyncpa [#allocation4 + $0x1], 1 }

</bundles_post_ra>
